<compile_context>
chip_gen: v7x
topology: tpu7x:2x2x1
jax: 0.10.0
libtpu: 0.0.40
codegen_flags: <defaults>
</compile_context>

<pallas_src>
import functools

import jax
import jax.numpy as jnp
from jax.experimental import pallas as pl
from jax.experimental.pallas import tpu as pltpu

ALPHA = 1.0
GAMMA = 2.0
SMOOTH = 1e-6
LANES = 128


def _pow_const(v, gamma):
    """v**gamma for a compile-time constant gamma; v is strictly positive (clamped)."""
    if gamma == 2.0:
        return v * v                      # single VPU mul — no EUP transcendentals
    if gamma == 1.0:
        return v
    if float(gamma).is_integer() and 1.0 < gamma <= 4.0:
        r = v
        for _ in range(int(gamma) - 1):
            r = r * v
        return r
    return jnp.exp(gamma * jnp.log(v))    # general (EUP) path


def _binary_focal_loss_kernel(x_ref, t_ref, psum_ref, *, alpha, gamma, smooth):
    """One lane-dense tile of the binary focal loss.

    x_ref:    (TR, 128) logits (any float dtype; upcast to f32 in VMEM)
    t_ref:    (TR, 128) int32 labels in {0, 1}; padding rows use -1 (loss-neutral)
    psum_ref: (1, 8, 128) f32 per-(sublane, lane) partial sums for this grid step
    """
    x = x_ref[...].astype(jnp.float32)
    t = t_ref[...]

    pos = (t == 1).astype(jnp.float32)
    neg = (t == 0).astype(jnp.float32)

    # torch.sigmoid -> torch.clamp(smooth, 1 - smooth)
    prob = 1.0 / (1.0 + jnp.exp(-x))
    prob = jnp.clip(prob, smooth, 1.0 - smooth)

    pos_w = pos * _pow_const(1.0 - prob, gamma)
    neg_w = neg * _pow_const(prob, gamma)

    log_p = jnp.log(prob)
    # F.logsigmoid(-x) = -softplus(x) = -(max(x, 0) + log(1 + exp(-|x|)))
    log_sig_neg = -(jnp.maximum(x, 0.0) + jnp.log(1.0 + jnp.exp(-jnp.abs(x))))

    loss = -pos_w * log_p - alpha * neg_w * log_sig_neg        # (TR, 128)

    # Per-(sublane, lane) partial sums; cross-lane reduction is deferred to the wrapper.
    psum_ref[0] = loss.reshape(-1, 8, LANES).sum(axis=0)       # (8, 128)


def binary_focal_loss(output, target, *, alpha=ALPHA, gamma=GAMMA, smooth=SMOOTH,
                      tile_rows=1024):
    """output: logits of any shape (e.g. (B, 1, H, W)); target: binary labels broadcastable
    to output after target.unsqueeze(1). Returns the mean focal loss (scalar f32)."""
    # Mirror the PyTorch forward: target.unsqueeze(dim=1), then broadcast against output.
    t = jnp.expand_dims(target, 1)
    shape = jnp.broadcast_shapes(output.shape, t.shape)
    x = jnp.broadcast_to(output, shape).reshape(-1)
    t = jnp.broadcast_to(t, shape).reshape(-1).astype(jnp.int32)

    n = x.shape[0]
    rows = pl.cdiv(n, LANES)
    rows8 = ((rows + 7) // 8) * 8                 # sublane-align
    tile_r = min(int(tile_rows), rows8)           # both multiples of 8
    g = pl.cdiv(rows8, tile_r)
    rows_p = g * tile_r
    n_pad = rows_p * LANES - n

    # Pad with loss-neutral values: logit 0, label -1 (neither pos_mask nor neg_mask).
    x = jnp.pad(x, (0, n_pad))
    t = jnp.pad(t, (0, n_pad), constant_values=-1)
    x2 = x.reshape(rows_p, LANES)
    t2 = t.reshape(rows_p, LANES)

    kernel = functools.partial(
        _binary_focal_loss_kernel,
        alpha=float(alpha), gamma=float(gamma), smooth=float(smooth),
    )

    partials = pl.pallas_call(
        kernel,
        out_shape=jax.ShapeDtypeStruct((g, 8, LANES), jnp.float32),
        grid=(g,),
        in_specs=[
            pl.BlockSpec((tile_r, LANES), lambda i: (i, 0)),
            pl.BlockSpec((tile_r, LANES), lambda i: (i, 0)),
        ],
        out_specs=pl.BlockSpec((1, 8, LANES), lambda i: (i, 0, 0)),
        compiler_params=pltpu.CompilerParams(
            dimension_semantics=("parallel",),    # independent blocks -> megacore on v7x
        ),
    )(x2, t2)

    # Tiny final reduction in XLA. The PyTorch module's forward always applies .mean(),
    # regardless of the `reduction` ctor arg, so we do the same (divide by real, unpadded n).
    # TODO(synk): 'none'/'sum' reductions of the module ctor are never used by its forward.
    return jnp.sum(partials) / jnp.float32(n)


def binary_focal_loss_reference(output, target, *, alpha=ALPHA, gamma=GAMMA, smooth=SMOOTH):
    """Plain-JAX reference mirroring the PyTorch forward line by line."""
    prob = jax.nn.sigmoid(output)
    prob = jnp.clip(prob, smooth, 1.0 - smooth)
    t = jnp.expand_dims(target, 1)
    pos_mask = (t == 1).astype(output.dtype)
    neg_mask = (t == 0).astype(output.dtype)
    pos_weight = pos_mask * (1.0 - prob) ** gamma
    pos_loss = -pos_weight * jnp.log(prob)
    neg_weight = neg_mask * prob ** gamma
    neg_loss = -alpha * neg_weight * jax.nn.log_sigmoid(-output)
    loss = pos_loss + neg_loss
    return loss.mean()


if __name__ == "__main__":
    key = jax.random.PRNGKey(0)
    k_logits, k_tgt = jax.random.split(key)

    # Small binary-segmentation-style problem: logits (B, 1, H, W), labels (B, H, W) in {0,1}.
    B, C, H, W = 2, 1, 16, 16
    output = 2.0 * jax.random.normal(k_logits, (B, C, H, W), dtype=jnp.float32)
    target = jax.random.bernoulli(k_tgt, 0.4, (B, H, W)).astype(jnp.float32)

    out = binary_focal_loss(output, target)
    out = jax.block_until_ready(out)

    ref = binary_focal_loss_reference(output, target)
    assert jnp.allclose(out, ref, rtol=1e-5, atol=1e-6), (out, ref)

    print("KERNEL_OK")
</pallas_src>

<mosaic_0001>
module attributes {stable_mosaic.version = 11 : i64} {
  func.func @_binary_focal_loss_kernel(%arg0: i32, %arg1: memref<8x128xf32, #tpu.memory_space<vmem>>, %arg2: memref<8x128xi32, #tpu.memory_space<vmem>>, %arg3: memref<1x8x128xf32, #tpu.memory_space<vmem>>) attributes {dimension_semantics = [#tpu.dimension_semantics<parallel>], iteration_bounds = array<i64: 1>, scalar_prefetch = 0 : i64, scratch_operands = 0 : i64, tpu.core_type = #tpu.core_type<tc>, window_params = [{transform_indices = @transform_0, window_bounds = array<i64: 8, 128>}, {transform_indices = @transform_1, window_bounds = array<i64: 8, 128>}, {transform_indices = @transform_2, window_bounds = array<i64: 1, 8, 128>}]} {
    %c0 = arith.constant 0 : index
    %c0_0 = arith.constant 0 : index
    %0 = vector.load %arg1[%c0, %c0_0] : memref<8x128xf32, #tpu.memory_space<vmem>>, vector<8x128xf32>
    %c0_1 = arith.constant 0 : index
    %c0_2 = arith.constant 0 : index
    %1 = vector.load %arg2[%c0_1, %c0_2] : memref<8x128xi32, #tpu.memory_space<vmem>>, vector<8x128xi32>
    %c1_i32 = arith.constant 1 : i32
    %2 = vector.broadcast %c1_i32 : i32 to vector<8x128xi32>
    %3 = arith.cmpi eq, %1, %2 : vector<8x128xi32>
    %4 = arith.extui %3 : vector<8x128xi1> to vector<8x128xi32>
    %5 = arith.sitofp %4 : vector<8x128xi32> to vector<8x128xf32>
    %c0_i32 = arith.constant 0 : i32
    %6 = vector.broadcast %c0_i32 : i32 to vector<8x128xi32>
    %7 = arith.cmpi eq, %1, %6 : vector<8x128xi32>
    %8 = arith.extui %7 : vector<8x128xi1> to vector<8x128xi32>
    %9 = arith.sitofp %8 : vector<8x128xi32> to vector<8x128xf32>
    %cst = arith.constant 0.000000e+00 : f32
    %10 = vector.broadcast %cst : f32 to vector<8x128xf32>
    %11 = arith.subf %10, %0 : vector<8x128xf32>
    %12 = math.exp %11 : vector<8x128xf32>
    %cst_3 = arith.constant 1.000000e+00 : f32
    %13 = vector.broadcast %cst_3 : f32 to vector<8x128xf32>
    %14 = arith.addf %13, %12 : vector<8x128xf32>
    %cst_4 = arith.constant 1.000000e+00 : f32
    %15 = vector.broadcast %cst_4 : f32 to vector<8x128xf32>
    %16 = arith.divf %15, %14 : vector<8x128xf32>
    %cst_5 = arith.constant 9.99999997E-7 : f32
    %cst_6 = arith.constant 0.999998986 : f32
    %17 = vector.broadcast %cst_5 : f32 to vector<8x128xf32>
    %18 = arith.maximumf %17, %16 : vector<8x128xf32>
    %19 = vector.broadcast %cst_6 : f32 to vector<8x128xf32>
    %20 = arith.minimumf %19, %18 : vector<8x128xf32>
    %cst_7 = arith.constant 1.000000e+00 : f32
    %21 = vector.broadcast %cst_7 : f32 to vector<8x128xf32>
    %22 = arith.subf %21, %20 : vector<8x128xf32>
    %23 = arith.mulf %22, %22 : vector<8x128xf32>
    %24 = arith.mulf %5, %23 : vector<8x128xf32>
    %25 = arith.mulf %20, %20 : vector<8x128xf32>
    %26 = arith.mulf %9, %25 : vector<8x128xf32>
    %27 = math.log %20 : vector<8x128xf32>
    %cst_8 = arith.constant 0.000000e+00 : f32
    %28 = vector.broadcast %cst_8 : f32 to vector<8x128xf32>
    %29 = arith.maximumf %0, %28 : vector<8x128xf32>
    %30 = math.absf %0 : vector<8x128xf32>
    %cst_9 = arith.constant 0.000000e+00 : f32
    %31 = vector.broadcast %cst_9 : f32 to vector<8x128xf32>
    %32 = arith.subf %31, %30 : vector<8x128xf32>
    %33 = math.exp %32 : vector<8x128xf32>
    %cst_10 = arith.constant 1.000000e+00 : f32
    %34 = vector.broadcast %cst_10 : f32 to vector<8x128xf32>
    %35 = arith.addf %34, %33 : vector<8x128xf32>
    %36 = math.log %35 : vector<8x128xf32>
    %37 = arith.addf %29, %36 : vector<8x128xf32>
    %cst_11 = arith.constant 0.000000e+00 : f32
    %38 = vector.broadcast %cst_11 : f32 to vector<8x128xf32>
    %39 = arith.subf %38, %37 : vector<8x128xf32>
    %cst_12 = arith.constant 0.000000e+00 : f32
    %40 = vector.broadcast %cst_12 : f32 to vector<8x128xf32>
    %41 = arith.subf %40, %24 : vector<8x128xf32>
    %42 = arith.mulf %41, %27 : vector<8x128xf32>
    %cst_13 = arith.constant 1.000000e+00 : f32
    %43 = vector.broadcast %cst_13 : f32 to vector<8x128xf32>
    %44 = arith.mulf %43, %26 : vector<8x128xf32>
    %45 = arith.mulf %44, %39 : vector<8x128xf32>
    %46 = arith.subf %42, %45 : vector<8x128xf32>
    %47 = vector.shape_cast %46 : vector<8x128xf32> to vector<1x8x128xf32>
    %cst_14 = arith.constant dense<0.000000e+00> : vector<8x128xf32>
    %48 = vector.multi_reduction <add>, %47, %cst_14 [0] : vector<1x8x128xf32> to vector<8x128xf32>
    %c0_15 = arith.constant 0 : index
    %c0_16 = arith.constant 0 : index
    %c0_17 = arith.constant 0 : index
    %49 = vector.load %arg3[%c0_15, %c0_16, %c0_17] : memref<1x8x128xf32, #tpu.memory_space<vmem>>, vector<1x8x128xf32>
    %50 = vector.shape_cast %49 : vector<1x8x128xf32> to vector<8x128xf32>
    %51 = vector.shape_cast %48 : vector<8x128xf32> to vector<1x8x128xf32>
    tpu.vector_store %arg3[%c0_15, %c0_16, %c0_17], %51 {strides = array<i32>} : memref<1x8x128xf32, #tpu.memory_space<vmem>>, vector<1x8x128xf32>,
    return
  }
  func.func @transform_0(%arg0: i32) -> (i32, i32) {
    %c0_i32 = arith.constant 0 : i32
    %c0_i32_0 = arith.constant 0 : i32
    return %arg0, %c0_i32 : i32, i32
  }
  func.func @transform_1(%arg0: i32) -> (i32, i32) {
    %c0_i32 = arith.constant 0 : i32
    %c0_i32_0 = arith.constant 0 : i32
    return %arg0, %c0_i32 : i32, i32
  }
  func.func @transform_2(%arg0: i32) -> (i32, i32, i32) {
    %c0_i32 = arith.constant 0 : i32
    %c0_i32_0 = arith.constant 0 : i32
    %c0_i32_1 = arith.constant 0 : i32
    return %arg0, %c0_i32, %c0_i32_0 : i32, i32, i32
  }
}

</mosaic_0001>

<bundles_post_ra>
// kernel: tpu_custom_call.1
= control target key start
LH: loop header
LB: loop body
LE: loop exit
PB: predicated region body
PF: predicated region fallthrough
CT: control target
= control target key end

     0   :  { %7 = vsyncpa [#allocation3], 0  ;;  %s234_s0 = inlined_call_operand.hbm [shape: f32[8,128], index: 0, kind: input, shape index: {}]   ;;  %s235_s1 = inlined_call_operand.hbm [shape: s32[8,128], index: 1, kind: input, shape index: {}]   ;;  %s236_s2 = inlined_call_operand.hbm [shape: f32[1,8,128], index: 2, kind: output, shape index: {}]  }
   0x1   :  { %8 = vsyncpa [#allocation6], 0 }
   0x2   :  { %9 = vsyncpa [#allocation4], 0  ;;  %s179_s9 = smov [#allocation2]   ;;  %s180_s11 = smov [#allocation5]  }
   0x3   :  { %s16_s10 = sshll.u32 %s179_s9, 4  ;;  %s26_s12 = sshll.u32 %s180_s11, 4  ;;  %s17_s10 = int_to_ptr.vmem [resolvable:$true] %s16_s10  ;;  %s27_s12 = int_to_ptr.vmem [resolvable:$true] %s26_s12 }
   0x4   :  { %s107_s15 = scalar_lea.hbm %s234_s0, 128 }
   0x5   :  { %p108_p0 = scmp.ne.s32.totalorder %s234_s0, %s107_s15  ;;  %p111_p1 = scmp.lt.u32.totalorder %s107_s15, %s234_s0 }
   0x7   :  { %p113_p2 = pnand %p111_p1, %p108_p0 }
   0x9   :  { %116 = shalt.err (!%p113_p2)
}
   0xa   :  { %s117_s20 = scalar_lea.vmem %s17_s10, 128  ;;  %p122_p4 = scmp.lt.s32.totalorder %s17_s10, %s17_s10 }
   0xb   :  { %p118_p3 = scmp.ne.s32.totalorder %s17_s10, %s117_s20  ;;  %p123_p5 = scmp.lt.s32.totalorder %s117_s20, %s117_s20 }
   0xd   :  { %p124_p6 = por %p123_p5, %p122_p4 }
   0xf   :  { %p125_p7 = pnand %p124_p6, %p118_p3 }
  0x11   :  { %128 = shalt.err (!%p125_p7)
}
  0x12   :  { %19 = dma.hbm_to_vmem [thread:$0]  %s234_s0, 128, %s17_s10, [#allocation3]  }
  0x13   :  { %s129_s25 = scalar_lea.hbm %s235_s1, 128 }
  0x14   :  { %p130_p8 = scmp.ne.s32.totalorder %s235_s1, %s129_s25  ;;  %p133_p9 = scmp.lt.u32.totalorder %s129_s25, %s235_s1 }
  0x16   :  { %p135_p10 = pnand %p133_p9, %p130_p8 }
  0x18   :  { %138 = shalt.err (!%p135_p10)
}
  0x19   :  { %s139_s30 = scalar_lea.vmem %s27_s12, 128  ;;  %p144_p12 = scmp.lt.s32.totalorder %s27_s12, %s27_s12 }
  0x1a   :  { %p140_p11 = scmp.ne.s32.totalorder %s27_s12, %s139_s30  ;;  %p145_p13 = scmp.lt.s32.totalorder %s139_s30, %s139_s30 }
  0x1c   :  { %p146_p0 = por %p145_p13, %p144_p12 }
  0x1e   :  { %p147_p1 = pnand %p146_p0, %p140_p11 }
  0x20   :  { %150 = shalt.err (!%p147_p1)
}
  0x21   :  { %29 = dma.hbm_to_vmem [thread:$0]  %s235_s1, 128, %s27_s12, [#allocation6]  }
  0x22   :  { %173 = dma.done.wait [#allocation3], 128  }
  0x23   :  { %174 = vsyncadd [#allocation3], 4294967168 }
  0x24   :  { %175 = dma.done.wait [#allocation6], 128  }
  0x25   :  { %176 = vsyncadd [#allocation6], 4294967168  ;;  %v36_v0 = vld [vmem:[#allocation2] sm:$0xff]  ;;  %v37_v11 = vld [vmem:[#allocation5] sm:$0xff]  ;;  %v181_v18 = vmov 0.0   ;;  %s182_s1 = smov [#allocation7]  }
  0x26   :  { %v44_v1 = vsub.f32 0.0, %v36_v0  ;;  %v60_v2 = vand.u32 2147483647, %v36_v0  ;;  %vm38_vm0 = vcmp.eq.s32.totalorder %v37_v11, 1  ;;  %v59_v15 = vmax.f32 %v36_v0, 0.0  ;;  %s81_s4 = sshll.u32 %s182_s1, 4  ;;  %s82_s4 = int_to_ptr.vmem [resolvable:$true] %s81_s4 }
  0x27   :  { %vm41_vm1 = vcmp.eq.s32.totalorder %v37_v11, 0  ;;  %v91_v19 = vsel %vm38_vm0, 1.0, %v181_v18  ;;  %s151_s5 = scalar_lea.vmem %s82_s4, 128  ;;  %p156_p3 = scmp.lt.s32.totalorder %s82_s4, %s82_s4 }
  0x28   :  { %v45_v3 = vmul.f32 1.442695, %v44_v1  ;;  %v61_v4 = vsub.f32 0.0, %v60_v2  ;;  %v92_v23 = vsel %vm41_vm1, 1.0, %v181_v18  ;;  %p152_p2 = scmp.ne.s32.totalorder %s82_s4, %s151_s5  ;;  %p157_p4 = scmp.lt.s32.totalorder %s151_s5, %s151_s5 }
  0x2a   :  { %97 = vpow2.f32 %v45_v3  ;;  %v62_v5 = vmul.f32 1.442695, %v61_v4  ;;  %p158_p5 = por %p157_p4, %p156_p3 }
  0x2c   :  { %99 = vpow2.f32 %v62_v5  ;;  %p159_p6 = pnand %p158_p5, %p152_p2 }
  0x34   :  { %v98_v6 = vpop.eup %97 }
  0x35   :  { %v47_v7 = vadd.f32 1.0, %v98_v6 }
  0x36   :  { %v100_v8 = vpop.eup %99 }
  0x37   :  { %101 = vrcp.f32 %v47_v7  ;;  %v64_v9 = vadd.f32 1.0, %v100_v8 }
  0x39   :  { %103 = vlog2.f32 %v64_v9 }
  0x41   :  { %v102_v10 = vpop.eup %101 }
  0x42   :  { %v50_v12 = vmax.f32 %v102_v10, 1e-06 }
  0x43   :  { %v104_v13 = vpop.eup %103 }
  0x44   :  { %v51_v14 = vmin.f32 %v50_v12, 0.999999  ;;  %v66_v16 = vmul.f32 0.6931472, %v104_v13 }
  0x46   :  { %v52_v17 = vsub.f32 1.0, %v51_v14  ;;  %105 = vlog2.f32 %v51_v14  ;;  %v55_v21 = vmul.f32 %v51_v14, %v51_v14  ;;  %v67_v22 = vadd.f32 %v66_v16, %v59_v15 }
  0x48   :  { %v53_v20 = vmul.f32 %v52_v17, %v52_v17  ;;  %v56_v25 = vmul.f32 %v92_v23, %v55_v21  ;;  %v68_v26 = vsub.f32 0.0, %v67_v22 }
  0x4a   :  { %v54_v24 = vmul.f32 %v91_v19, %v53_v20  ;;  %v71_v30 = vmul.f32 %v68_v26, %v56_v25 }
  0x4c   :  { %v69_v27 = vsub.f32 0.0, %v54_v24 }
  0x50   :  { %v106_v28 = vpop.eup %105 }
  0x51   :  { %v58_v29 = vmul.f32 0.6931472, %v106_v28 }
  0x53   :  { %v70_v31 = vmul.f32 %v69_v27, %v58_v29 }
  0x55   :  { %v72_v32 = vsub.f32 %v70_v31, %v71_v30 }
  0x57   :  { %74 = vst [vmem:[#allocation7] sm:$0xff] %v72_v32 }
  0x58   :  { %162 = shalt.err (!%p159_p6)
}
  0x59   :  { %s163_s8 = scalar_lea.hbm %s236_s2, 128 }
  0x5a   :  { %p164_p7 = scmp.ne.s32.totalorder %s236_s2, %s163_s8  ;;  %p167_p8 = scmp.lt.u32.totalorder %s163_s8, %s236_s2 }
  0x5c   :  { %p169_p9 = pnand %p167_p8, %p164_p7 }
  0x5e   :  { %172 = shalt.err (!%p169_p9)
}
  0x5f   :  { %84 = dma.vmem_to_hbm [thread:$0]  %s82_s4, 128, %s236_s2, [#allocation4]  }
  0x60   :  { %177 = dma.done.wait [#allocation4], 128  }
  0x61   :  { %178 = vsyncadd [#allocation4], 4294967168 }
  0x62   :  { %88 = vsyncpa [#allocation3], 1 }
  0x63   :  { %89 = vsyncpa [#allocation6], 1 }
  0x64   :  { %90 = vsyncpa [#allocation4], 1 }

</bundles_post_ra>
